<compile_context>
chip_gen: v7x
topology: tpu7x:2x2x1
jax: 0.10.0
libtpu: 0.0.40
codegen_flags: <defaults>
</compile_context>

<pallas_src>
import functools

import jax
import jax.numpy as jnp
import numpy as np
from jax.experimental import pallas as pl
from jax.experimental.pallas import tpu as pltpu


def _iou_sums_kernel(x_ref, t_ref, i_out, y_out, z_out,
                     i_acc, y_acc, z_acc, *,
                     apply_softmax: bool, hw_total: int, tile: int):
    h = pl.program_id(1)
    n_h = pl.num_programs(1)

    # Scratch accumulators are reset at the start of each batch's HW loop.
    @pl.when(h == 0)
    def _():
        i_acc[...] = jnp.zeros_like(i_acc)
        y_acc[...] = jnp.zeros_like(y_acc)
        z_acc[...] = jnp.zeros_like(z_acc)

    x = x_ref[0].astype(jnp.float32)      # (C, T)  cast happens in VMEM
    t = t_ref[0].astype(jnp.int32)        # (1, T)  int8 -> int32
    C, T = x.shape

    # Valid-lane mask for the (possibly padded) last HW tile.  Padded lanes
    # contain undefined data; jnp.where also kills any NaN/Inf they produce.
    valid = hw_total - h * tile
    lane = jax.lax.broadcasted_iota(jnp.int32, (1, T), 1)
    lane_ok = lane < valid                # (1, T) bool

    if apply_softmax:
        m = jnp.max(x, axis=0, keepdims=True)
        e = jnp.exp(x - m)
        inv = pl.reciprocal(jnp.sum(e, axis=0, keepdims=True), approx=False)
        p = e * inv
    else:
        p = x

    p = jnp.where(lane_ok, p, 0.0)        # (C, T)

    # On-the-fly one-hot as a boolean mask (no float one-hot, no onehot*onehot).
    cls = jax.lax.broadcasted_iota(jnp.int32, (C, T), 0)
    hit = jnp.logical_and(t == cls, lane_ok)          # (C, T) bool

    i_acc[...] += jnp.sum(jnp.where(hit, p, 0.0), axis=1, keepdims=True)  # (C,1)
    y_acc[...] += jnp.sum(hit.astype(jnp.float32), axis=1, keepdims=True)
    z_acc[...] += jnp.sum(p * p, axis=1, keepdims=True)

    # Write the per-batch outputs once, after the last HW tile.
    @pl.when(h == n_h - 1)
    def _():
        i_out[0] = i_acc[...]
        y_out[0] = y_acc[...]
        z_out[0] = z_acc[...]


def _pick_tile(n_classes, hw, itemsize):
    # Keep 2 double-buffered x tiles (+ small label tiles) under ~8 MiB so the
    # kernel fits the v7x scoped-VMEM default with plenty of headroom; larger
    # tiles on v5e/v6e buy little once >= several K lanes.
    per_buf_budget = 4 * 1024 * 1024
    max_t = max(128, per_buf_budget // max(1, n_classes * itemsize))
    max_t = (max_t // 128) * 128
    hw_pad = ((hw + 127) // 128) * 128
    return max(128, min(max_t, hw_pad, 32768))


def iou_loss(inputs, target, n_classes, weight=None, softmax=True, tile=None):
    """inputs: [B, C, H, W] float logits (any float dtype); target: [B, H, W] int labels."""
    B, C, H, W = inputs.shape
    assert C == n_classes, f"predict C={C} & n_classes={n_classes} do not match"
    assert n_classes <= 127, "int8 label path requires n_classes <= 127"
    HW = H * W

    x = inputs.reshape(B, C, HW)                       # native dtype, no upcast
    t = target.reshape(B, 1, HW).astype(jnp.int8)      # narrow label stream

    itemsize = jnp.dtype(x.dtype).itemsize
    if tile is None:
        tile = _pick_tile(C, HW, itemsize)
    n_t = pl.cdiv(HW, tile)

    kernel = functools.partial(_iou_sums_kernel,
                               apply_softmax=softmax, hw_total=HW, tile=tile)

    cost = pl.CostEstimate(
        flops=8 * B * C * HW,
        transcendentals=B * C * HW,
        bytes_accessed=x.size * itemsize + t.size + 3 * B * C * 4,
    )

    out_sds = jax.ShapeDtypeStruct((B, C, 1), jnp.float32)
    out_spec = pl.BlockSpec((1, C, 1), lambda b, h: (b, 0, 0))

    i_b, y_b, z_b = pl.pallas_call(
        kernel,
        out_shape=(out_sds, out_sds, out_sds),
        grid_spec=pltpu.PrefetchScalarGridSpec(
            num_scalar_prefetch=0,
            grid=(B, n_t),
            in_specs=[
                pl.BlockSpec((1, C, tile), lambda b, h: (b, 0, h)),
                pl.BlockSpec((1, 1, tile), lambda b, h: (b, 0, h)),
            ],
            out_specs=[out_spec, out_spec, out_spec],
            scratch_shapes=[pltpu.VMEM((C, 1), jnp.float32)] * 3,
        ),
        compiler_params=pltpu.CompilerParams(
            dimension_semantics=("parallel", "arbitrary")),
        cost_estimate=cost,
    )(x, t)

    # Final reductions / combine in f32 (tiny, plain JAX).
    intersect = jnp.sum(i_b[:, :, 0], axis=0)          # (C,)
    y_sum = jnp.sum(y_b[:, :, 0], axis=0)
    z_sum = jnp.sum(z_b[:, :, 0], axis=0)

    smooth = 1.0
    ratio = (intersect + smooth) / (z_sum + y_sum - intersect + smooth)
    per_class_loss = 1.0 - ratio                       # == _iou_loss per class

    if weight is None:
        weight = jnp.ones((n_classes,), jnp.float32)
    else:
        weight = jnp.asarray(weight, jnp.float32)

    return jnp.sum(per_class_loss * weight) / n_classes


def _reference_iou_loss(inputs, target, n_classes):
    # pure-JAX reference mirroring the PyTorch module
    p = jax.nn.softmax(inputs.astype(jnp.float32), axis=1)
    onehot = (target[:, None, :, :] ==
              jnp.arange(n_classes)[None, :, None, None]).astype(jnp.float32)
    smooth = 1.0
    loss = 0.0
    for i in range(n_classes):
        s, tt = p[:, i], onehot[:, i]
        inter = jnp.sum(s * tt)
        y = jnp.sum(tt * tt)
        z = jnp.sum(s * s)
        loss += 1.0 - (inter + smooth) / (z + y - inter + smooth)
    return loss / n_classes


if __name__ == "__main__":
    B, C, H, W = 2, 4, 16, 18  # n_classes = 4, HW = 288 (ragged vs tile=128)
    key = jax.random.PRNGKey(0)
    k1, k2 = jax.random.split(key)
    inputs_f32 = jax.random.normal(k1, (B, C, H, W), dtype=jnp.float32)
    target = jax.random.randint(k2, (B, H, W), 0, C, dtype=jnp.int32)

    # 1) f32 logits, forced small tile -> exercises multi-tile + ragged-lane mask.
    loss = jax.block_until_ready(
        iou_loss(inputs_f32, target, n_classes=C, softmax=True, tile=128))
    ref = jax.block_until_ready(_reference_iou_loss(inputs_f32, target, C))
    np.testing.assert_allclose(np.asarray(loss), np.asarray(ref),
                               rtol=1e-5, atol=1e-5)

    # 2) bf16 logits, auto tile -> exercises native-dtype path (no wrapper upcast).
    inputs_bf16 = inputs_f32.astype(jnp.bfloat16)
    loss_bf = jax.block_until_ready(
        iou_loss(inputs_bf16, target, n_classes=C, softmax=True))
    ref_bf = jax.block_until_ready(_reference_iou_loss(inputs_bf16, target, C))
    np.testing.assert_allclose(np.asarray(loss_bf), np.asarray(ref_bf),
                               rtol=1e-4, atol=1e-4)

    print("KERNEL_OK")
</pallas_src>

<mosaic_0001>
module attributes {stable_mosaic.version = 11 : i64} {
  func.func @_iou_sums_kernel(%arg0: i32, %arg1: i32, %arg2: memref<1x4x128xf32, #tpu.memory_space<vmem>>, %arg3: memref<1x1x128xi8, #tpu.memory_space<vmem>>, %arg4: memref<1x4x1xf32, #tpu.memory_space<vmem>>, %arg5: memref<1x4x1xf32, #tpu.memory_space<vmem>>, %arg6: memref<1x4x1xf32, #tpu.memory_space<vmem>>, %arg7: memref<4x1xf32, #tpu.memory_space<vmem>>, %arg8: memref<4x1xf32, #tpu.memory_space<vmem>>, %arg9: memref<4x1xf32, #tpu.memory_space<vmem>>) attributes {dimension_semantics = [#tpu.dimension_semantics<parallel>, #tpu.dimension_semantics<arbitrary>], iteration_bounds = array<i64: 2, 3>, scalar_prefetch = 0 : i64, scratch_operands = 3 : i64, tpu.core_type = #tpu.core_type<tc>, window_params = [{transform_indices = @transform_0, window_bounds = array<i64: 1, 4, 128>}, {transform_indices = @transform_1, window_bounds = array<i64: 1, 1, 128>}, {transform_indices = @transform_2, window_bounds = array<i64: 1, 4, 1>}, {transform_indices = @transform_3, window_bounds = array<i64: 1, 4, 1>}, {transform_indices = @transform_4, window_bounds = array<i64: 1, 4, 1>}]} {
    %c0_i32 = arith.constant 0 : i32
    %0 = arith.cmpi eq, %arg1, %c0_i32 : i32
    %1 = arith.extui %0 : i1 to i32
    %c0_i32_0 = arith.constant 0 : i32
    %2 = arith.cmpi ne, %1, %c0_i32_0 : i32
    scf.if %2 {
      %cst_25 = arith.constant 0.000000e+00 : f32
      %55 = vector.broadcast %cst_25 : f32 to vector<4x1xf32>
      %c0_26 = arith.constant 0 : index
      %c0_27 = arith.constant 0 : index
      %56 = vector.load %arg7[%c0_26, %c0_27] : memref<4x1xf32, #tpu.memory_space<vmem>>, vector<4x1xf32>
      tpu.vector_store %arg7[%c0_26, %c0_27], %55 {strides = array<i32>} : memref<4x1xf32, #tpu.memory_space<vmem>>, vector<4x1xf32>,
      %cst_28 = arith.constant 0.000000e+00 : f32
      %57 = vector.broadcast %cst_28 : f32 to vector<4x1xf32>
      %c0_29 = arith.constant 0 : index
      %c0_30 = arith.constant 0 : index
      %58 = vector.load %arg8[%c0_29, %c0_30] : memref<4x1xf32, #tpu.memory_space<vmem>>, vector<4x1xf32>
      tpu.vector_store %arg8[%c0_29, %c0_30], %57 {strides = array<i32>} : memref<4x1xf32, #tpu.memory_space<vmem>>, vector<4x1xf32>,
      %cst_31 = arith.constant 0.000000e+00 : f32
      %59 = vector.broadcast %cst_31 : f32 to vector<4x1xf32>
      %c0_32 = arith.constant 0 : index
      %c0_33 = arith.constant 0 : index
      %60 = vector.load %arg9[%c0_32, %c0_33] : memref<4x1xf32, #tpu.memory_space<vmem>>, vector<4x1xf32>
      tpu.vector_store %arg9[%c0_32, %c0_33], %59 {strides = array<i32>} : memref<4x1xf32, #tpu.memory_space<vmem>>, vector<4x1xf32>,
    } else {
    }
    %c0 = arith.constant 0 : index
    %c0_1 = arith.constant 0 : index
    %c0_2 = arith.constant 0 : index
    %3 = vector.load %arg2[%c0, %c0_1, %c0_2] : memref<1x4x128xf32, #tpu.memory_space<vmem>>, vector<1x4x128xf32>
    %4 = vector.shape_cast %3 : vector<1x4x128xf32> to vector<4x128xf32>
    %c0_3 = arith.constant 0 : index
    %c0_4 = arith.constant 0 : index
    %c0_5 = arith.constant 0 : index
    %5 = vector.load %arg3[%c0_3, %c0_4, %c0_5] : memref<1x1x128xi8, #tpu.memory_space<vmem>>, vector<1x1x128xi8>
    %6 = vector.shape_cast %5 : vector<1x1x128xi8> to vector<1x128xi8>
    %7 = arith.extsi %6 : vector<1x128xi8> to vector<1x128xi32>
    %c128_i32 = arith.constant 128 : i32
    %8 = arith.muli %arg1, %c128_i32 : i32
    %c288_i32 = arith.constant 288 : i32
    %9 = arith.subi %c288_i32, %8 : i32
    %10 = tpu.iota {dimensions = array<i32: 1>} : vector<1x128xi32>
    %11 = vector.broadcast %9 : i32 to vector<1x128xi32>
    %12 = arith.cmpi slt, %10, %11 : vector<1x128xi32>
    %cst = arith.constant dense<0xFF800000> : vector<128xf32>
    %13 = vector.multi_reduction <maximumf>, %4, %cst [0] : vector<4x128xf32> to vector<128xf32>
    %14 = vector.shape_cast %13 : vector<128xf32> to vector<1x128xf32>
    %15 = vector.broadcast %14 : vector<1x128xf32> to vector<4x128xf32>
    %16 = arith.subf %4, %15 : vector<4x128xf32>
    %17 = math.exp %16 : vector<4x128xf32>
    %cst_6 = arith.constant dense<0.000000e+00> : vector<128xf32>
    %18 = vector.multi_reduction <add>, %17, %cst_6 [0] : vector<4x128xf32> to vector<128xf32>
    %19 = vector.shape_cast %18 : vector<128xf32> to vector<1x128xf32>
    %20 = tpu.reciprocal %19 : vector<1x128xf32> -> vector<1x128xf32>
    %21 = vector.broadcast %20 : vector<1x128xf32> to vector<4x128xf32>
    %22 = arith.mulf %17, %21 : vector<4x128xf32>
    %cst_7 = arith.constant 0.000000e+00 : f32
    %23 = vector.shape_cast %12 : vector<1x128xi1> to vector<1x128xi1>
    %24 = vector.broadcast %23 : vector<1x128xi1> to vector<4x128xi1>
    %25 = vector.broadcast %cst_7 : f32 to vector<4x128xf32>
    %26 = arith.select %24, %22, %25 : vector<4x128xi1>, vector<4x128xf32>
    %27 = tpu.iota {dimensions = array<i32: 0>} : vector<4x128xi32>
    %28 = vector.broadcast %7 : vector<1x128xi32> to vector<4x128xi32>
    %29 = arith.cmpi eq, %28, %27 : vector<4x128xi32>
    %30 = vector.broadcast %12 : vector<1x128xi1> to vector<4x128xi1>
    %31 = arith.andi %29, %30 : vector<4x128xi1>
    %c0_8 = arith.constant 0 : index
    %c0_9 = arith.constant 0 : index
    %32 = vector.load %arg7[%c0_8, %c0_9] : memref<4x1xf32, #tpu.memory_space<vmem>>, vector<4x1xf32>
    %cst_10 = arith.constant 0.000000e+00 : f32
    %33 = vector.broadcast %cst_10 : f32 to vector<4x128xf32>
    %34 = arith.select %31, %26, %33 : vector<4x128xi1>, vector<4x128xf32>
    %cst_11 = arith.constant dense<0.000000e+00> : vector<4xf32>
    %35 = vector.multi_reduction <add>, %34, %cst_11 [1] : vector<4x128xf32> to vector<4xf32>
    %36 = vector.shape_cast %35 : vector<4xf32> to vector<4x1xf32>
    %37 = arith.addf %32, %36 : vector<4x1xf32>
    %c0_12 = arith.constant 0 : index
    %c0_13 = arith.constant 0 : index
    %38 = vector.load %arg7[%c0_12, %c0_13] : memref<4x1xf32, #tpu.memory_space<vmem>>, vector<4x1xf32>
    tpu.vector_store %arg7[%c0_12, %c0_13], %37 {strides = array<i32>} : memref<4x1xf32, #tpu.memory_space<vmem>>, vector<4x1xf32>,
    %c0_14 = arith.constant 0 : index
    %c0_15 = arith.constant 0 : index
    %39 = vector.load %arg8[%c0_14, %c0_15] : memref<4x1xf32, #tpu.memory_space<vmem>>, vector<4x1xf32>
    %40 = arith.extui %31 : vector<4x128xi1> to vector<4x128xi32>
    %41 = arith.sitofp %40 : vector<4x128xi32> to vector<4x128xf32>
    %cst_16 = arith.constant dense<0.000000e+00> : vector<4xf32>
    %42 = vector.multi_reduction <add>, %41, %cst_16 [1] : vector<4x128xf32> to vector<4xf32>
    %43 = vector.shape_cast %42 : vector<4xf32> to vector<4x1xf32>
    %44 = arith.addf %39, %43 : vector<4x1xf32>
    %c0_17 = arith.constant 0 : index
    %c0_18 = arith.constant 0 : index
    %45 = vector.load %arg8[%c0_17, %c0_18] : memref<4x1xf32, #tpu.memory_space<vmem>>, vector<4x1xf32>
    tpu.vector_store %arg8[%c0_17, %c0_18], %44 {strides = array<i32>} : memref<4x1xf32, #tpu.memory_space<vmem>>, vector<4x1xf32>,
    %c0_19 = arith.constant 0 : index
    %c0_20 = arith.constant 0 : index
    %46 = vector.load %arg9[%c0_19, %c0_20] : memref<4x1xf32, #tpu.memory_space<vmem>>, vector<4x1xf32>
    %47 = arith.mulf %26, %26 : vector<4x128xf32>
    %cst_21 = arith.constant dense<0.000000e+00> : vector<4xf32>
    %48 = vector.multi_reduction <add>, %47, %cst_21 [1] : vector<4x128xf32> to vector<4xf32>
    %49 = vector.shape_cast %48 : vector<4xf32> to vector<4x1xf32>
    %50 = arith.addf %46, %49 : vector<4x1xf32>
    %c0_22 = arith.constant 0 : index
    %c0_23 = arith.constant 0 : index
    %51 = vector.load %arg9[%c0_22, %c0_23] : memref<4x1xf32, #tpu.memory_space<vmem>>, vector<4x1xf32>
    tpu.vector_store %arg9[%c0_22, %c0_23], %50 {strides = array<i32>} : memref<4x1xf32, #tpu.memory_space<vmem>>, vector<4x1xf32>,
    %c2_i32 = arith.constant 2 : i32
    %52 = arith.cmpi eq, %arg1, %c2_i32 : i32
    %53 = arith.extui %52 : i1 to i32
    %c0_i32_24 = arith.constant 0 : i32
    %54 = arith.cmpi ne, %53, %c0_i32_24 : i32
    scf.if %54 {
      %c0_25 = arith.constant 0 : index
      %c0_26 = arith.constant 0 : index
      %55 = vector.load %arg7[%c0_25, %c0_26] : memref<4x1xf32, #tpu.memory_space<vmem>>, vector<4x1xf32>
      %c0_27 = arith.constant 0 : index
      %c0_28 = arith.constant 0 : index
      %c0_29 = arith.constant 0 : index
      %56 = vector.load %arg4[%c0_27, %c0_28, %c0_29] : memref<1x4x1xf32, #tpu.memory_space<vmem>>, vector<1x4x1xf32>
      %57 = vector.shape_cast %56 : vector<1x4x1xf32> to vector<4x1xf32>
      %58 = vector.shape_cast %55 : vector<4x1xf32> to vector<1x4x1xf32>
      tpu.vector_store %arg4[%c0_27, %c0_28, %c0_29], %58 {strides = array<i32>} : memref<1x4x1xf32, #tpu.memory_space<vmem>>, vector<1x4x1xf32>,
      %c0_30 = arith.constant 0 : index
      %c0_31 = arith.constant 0 : index
      %59 = vector.load %arg8[%c0_30, %c0_31] : memref<4x1xf32, #tpu.memory_space<vmem>>, vector<4x1xf32>
      %c0_32 = arith.constant 0 : index
      %c0_33 = arith.constant 0 : index
      %c0_34 = arith.constant 0 : index
      %60 = vector.load %arg5[%c0_32, %c0_33, %c0_34] : memref<1x4x1xf32, #tpu.memory_space<vmem>>, vector<1x4x1xf32>
      %61 = vector.shape_cast %60 : vector<1x4x1xf32> to vector<4x1xf32>
      %62 = vector.shape_cast %59 : vector<4x1xf32> to vector<1x4x1xf32>
      tpu.vector_store %arg5[%c0_32, %c0_33, %c0_34], %62 {strides = array<i32>} : memref<1x4x1xf32, #tpu.memory_space<vmem>>, vector<1x4x1xf32>,
      %c0_35 = arith.constant 0 : index
      %c0_36 = arith.constant 0 : index
      %63 = vector.load %arg9[%c0_35, %c0_36] : memref<4x1xf32, #tpu.memory_space<vmem>>, vector<4x1xf32>
      %c0_37 = arith.constant 0 : index
      %c0_38 = arith.constant 0 : index
      %c0_39 = arith.constant 0 : index
      %64 = vector.load %arg6[%c0_37, %c0_38, %c0_39] : memref<1x4x1xf32, #tpu.memory_space<vmem>>, vector<1x4x1xf32>
      %65 = vector.shape_cast %64 : vector<1x4x1xf32> to vector<4x1xf32>
      %66 = vector.shape_cast %63 : vector<4x1xf32> to vector<1x4x1xf32>
      tpu.vector_store %arg6[%c0_37, %c0_38, %c0_39], %66 {strides = array<i32>} : memref<1x4x1xf32, #tpu.memory_space<vmem>>, vector<1x4x1xf32>,
    } else {
    }
    return
  }
  func.func @transform_0(%arg0: i32, %arg1: i32) -> (i32, i32, i32) {
    %c0_i32 = arith.constant 0 : i32
    %c0_i32_0 = arith.constant 0 : i32
    return %arg0, %c0_i32, %arg1 : i32, i32, i32
  }
  func.func @transform_1(%arg0: i32, %arg1: i32) -> (i32, i32, i32) {
    %c0_i32 = arith.constant 0 : i32
    %c0_i32_0 = arith.constant 0 : i32
    return %arg0, %c0_i32, %arg1 : i32, i32, i32
  }
  func.func @transform_2(%arg0: i32, %arg1: i32) -> (i32, i32, i32) {
    %c0_i32 = arith.constant 0 : i32
    %c0_i32_0 = arith.constant 0 : i32
    %c0_i32_1 = arith.constant 0 : i32
    return %arg0, %c0_i32, %c0_i32_0 : i32, i32, i32
  }
  func.func @transform_3(%arg0: i32, %arg1: i32) -> (i32, i32, i32) {
    %c0_i32 = arith.constant 0 : i32
    %c0_i32_0 = arith.constant 0 : i32
    %c0_i32_1 = arith.constant 0 : i32
    return %arg0, %c0_i32, %c0_i32_0 : i32, i32, i32
  }
  func.func @transform_4(%arg0: i32, %arg1: i32) -> (i32, i32, i32) {
    %c0_i32 = arith.constant 0 : i32
    %c0_i32_0 = arith.constant 0 : i32
    %c0_i32_1 = arith.constant 0 : i32
    return %arg0, %c0_i32, %c0_i32_0 : i32, i32, i32
  }
}

</mosaic_0001>

<bundles_post_ra>
// kernel: tpu_custom_call.1
= control target key start
LH: loop header
LB: loop body
LE: loop exit
PB: predicated region body
PF: predicated region fallthrough
CT: control target
= control target key end

     0   :  { %10 = vsyncpa [#allocation6], 0  ;;  %s934_s0 = inlined_call_operand.hbm [shape: f32[2,4,288], index: 0, kind: input, shape index: {}]   ;;  %s935_s1 = inlined_call_operand.vmem [shape: s8[2,1,288], index: 1, kind: input, shape index: {}]   ;;  %s936_s2 = inlined_call_operand.vmem [shape: f32[2,4,1], index: 2, kind: output, shape index: {0}]   ;;  %s937_s3 = inlined_call_operand.vmem [shape: f32[2,4,1], index: 3, kind: output, shape index: {1}]   ;;  %s938_s4 = inlined_call_operand.vmem [shape: f32[2,4,1], index: 4, kind: output, shape index: {2}]  }
   0x1   :  { %12 = vsyncpa [#allocation6 + $0x1], 0  ;;  %s736_s15 = smov 0   ;;  %s738_s16 = smov 0  }
   0x2   :  { %s740_s17 = smov 0   ;;  %s742_s18 = smov 0  }
   0x3   :  { %s744_s19 = smov 0   ;;  %s746_s20 = smov 0  }
   0x4   :  { %s748_s21 = smov 0   ;;  %s750_s22 = smov 0  }
   0x5 LB: > { %s514_s23 = sadd.s32 4294967295, %s706_s22   ;;  %s27_s24 = sadd.s32 1, %s698_s20  ;;  %s706_s22 = sphi %s750_s22, %s18_s22   ;;  %s702_s21 = sphi %s748_s21, %s950_s21   ;;  %s698_s20 = sphi %s746_s20, %s949_s20   ;;  %s694_s19 = sphi %s744_s19, %s948_s19   ;;  %s690_s18 = sphi %s742_s18, %s947_s18   ;;  %s686_s17 = sphi %s740_s17, %s946_s17   ;;  %s682_s16 = sphi %s738_s16, %s945_s16   ;;  %s678_s15 = sphi %s736_s15, %s944_s15  }
   0x6   : > { %p28_p0 = scmp.ge.s32.totalorder %s27_s24, 3  ;;  %s30_s25 = sadd.s32 1, %s702_s21 }
   0x7   : > { %s39_s26 = sadd.s32 1, %s686_s17  ;;  %p46_p1 = scmp.ne.s32.totalorder %s686_s17, %s682_s16 }
   0x8   : > { %s952_s24 = smov (%p28_p0, %s27_s24), 0  ;;  %s954_s25 = smov (!%p28_p0, %s30_s25), %s702_s21 }
   0x9   : > { %s35_s27 = ssub.s32 %s698_s20, %s952_s24  ;;  %p47_p2 = scmp.eq.s32.totalorder %s706_s22, 0 }
   0xa   : > { %p32_p3 = scmp.ge.s32.totalorder %s954_s25, 2  ;;  %p52_p4 = scmp.ne.s32.totalorder %s682_s16, %s678_s15 }
   0xb   : > { %p787_p5 = por %p47_p2, %p46_p1  ;;  %p53_p6 = scmp.eq.s32.totalorder %s514_s23, 0 }
   0xc   : > { %s956_s25 = smov (%p32_p3, %s954_s25), 0  ;;  %p539_p8 = scmp.lt.s32.totalorder %s706_s22, 6 }
   0xd   : > { %p793_p7 = por %p53_p6, %p52_p4  ;;  %s34_s30 = ssub.s32 %s702_s21, %s956_s25 }
   0xe   : > { %s36_s5 = sor.u32 %s35_s27, %s34_s30  ;;  %s182_s6 = sand.u32 1, %s686_s17  }
   0xf   : > { %p37_p9 = scmp.eq.s32.totalorder %s36_s5, 0  ;;  %s518_s7 = sshll.u32 %s182_s6, 2 }
  0x10   : > { %s531_s8 = smul.u32 3, %s702_s21  ;;  %s186_s12 = scalar_lea.vmem [#allocation5], %s518_s7 }
  0x11   : > { %s803_s9 = scalar_select %p37_p9, %s686_s17, %s39_s26  }
  0x12   : > { %s191_s10 = sadd.s32 %s698_s20, %s531_s8  ;;  %s195_s13 = sshll.u32 %s186_s12, 4  ;;  %s811_s13 = int_to_ptr.vmem [resolvable:$true] %s195_s13 }
  0x13   : > { %s519_s11 = sshll.u32 %s191_s10, 6  ;;  %p817_p10 = pnand %p539_p8, %p787_p5 }
  0x14   : > { %s809_s23 = scalar_lea.hbm %s934_s0, %s519_s11  ;;  %s183_s27 = scalar_lea.sflag [#allocation6], %s182_s6 }
  0x15   : > { %s610_s30 = scalar_lea.hbm %s809_s23, 64  ;;  %p612_p0 = pneg %p817_p10 }
  0x16   : > { %p611_p13 = scmp.ne.s32.totalorder %s809_s23, %s610_s30  ;;  %s615_s7 = scalar_lea.hbm %s934_s0, 384 }
  0x17   : > { %p616_p3 = scmp.lt.u32.totalorder %s809_s23, %s934_s0  ;;  %p617_p4 = scmp.lt.u32.totalorder %s615_s7, %s610_s30 }
  0x18   : > { %p613_p1 = pnand %p612_p0, %p611_p13  ;;  %p619_p6 = scmp.lt.u32.totalorder %s610_s30, %s809_s23 }
  0x19   : > { %p618_p5 = por %p617_p4, %p616_p3 }
  0x1a   : > { %p614_p2 = pneg %p613_p1 }
  0x1b   : > { %p620_p8 = por %p619_p6, %p618_p5 }
  0x1d   : > { %p621_p9 = pnand %p620_p8, %p614_p2 }
  0x1f   : > { %624 = shalt.err (!%p621_p9)
}
  0x20   : > { %s625_s6 = scalar_lea.vmem %s811_s13, 64  ;;  %s708_s11 = smov [#allocation5]  }
  0x21   : > { %p626_p13 = scmp.ne.s32.totalorder %s811_s13, %s625_s6  ;;  %s630_s12 = sshll.u32 %s708_s11, 4  ;;  %s631_s12 = int_to_ptr.vmem [resolvable:$false] %s630_s12 }
  0x22   : > { %s632_s14 = scalar_lea.vmem %s631_s12, 128  ;;  %p633_p12 = scmp.lt.s32.totalorder %s811_s13, %s631_s12 }
  0x23   : > { %p628_p1 = pnand %p626_p13, %p612_p0  ;;  %p634_p3 = scmp.lt.s32.totalorder %s632_s14, %s625_s6 }
  0x25   : > { %p629_p11 = pneg %p628_p1  ;;  %p635_p4 = por %p634_p3, %p633_p12 }
  0x27   : > { %p636_p5 = pnand %p635_p4, %p629_p11 }
  0x29   : > { %639 = shalt.err (!%p636_p5)
}
  0x2a   : > { %538 = dma.hbm_to_vmem [thread:$0]  (!%p817_p10), %s809_s23, 64, %s811_s13, %s183_s27  }
  0x2b   : > { %p942_p2 = scmp.lt.s32.totalorder %s706_s22, 7  ;;  %p943_p6 = scmp.ge.s32.totalorder %s706_s22, 1 }
  0x2d   : > { %p211_p0 = pnand %p943_p6, %p942_p2 }
  0x2e   : > { %s216_s15 = sand.u32 (!%p211_p0), 1, %s682_s16  }
  0x2f   : > { %214 = sbr.rel (%p211_p0) target bundleno = 284 (0x11c), region = 28  ;;  %s521_s30 = sshll.u32 (!%p211_p0), %s216_s15, 2 }
  0x30   : > { %s217_s5 = scalar_lea.sflag (!%p211_p0), [#allocation6], %s216_s15  ;;  %s220_s28 = scalar_lea.vmem (!%p211_p0), [#allocation5], %s521_s30 }
  0x36   : > { %673 = dma.done.wait (%p793_p7), %s217_s5, 64  }
  0x37   : > { %675 = vsyncadd (%p793_p7), %s217_s5, 4294967232  ;;  %p259_p10 = scmp.lt.s32.totalorder %s694_s19, 1  ;;  %p261_p11 = scmp.lt.s32.totalorder %s690_s18, 2 }
  0x38   : > { %p525_p7 = scmp.ne.s32.totalorder %s690_s18, 0 }
  0x39   : > { %s958_s19 = smov (!%p259_p10, %s694_s19), 1  ;;  %vm282_vm0 = vcmask (!%p525_p7), 3072   ;;  %v709_v0 = vmov (!%p525_p7), 0.0  }
  0x3a   : > { %s262_s13 = scalar_select %p261_p11, %s690_s18, 2 }
  0x3b   : > { %s532_s23 = smul.u32 3, %s958_s19  ;;  %s861_s26 = sshll.u32 %s958_s19, 2  ;;  %283 = vst.msk [vmem:[#allocation2] sm:$0xf] (!%p525_p7), %vm282_vm0, %v709_v0  ;;  %284 = vst.msk [vmem:[#allocation3] sm:$0xf] (!%p525_p7), %vm282_vm0, %v709_v0 }
  0x3c   : > { %s269_s8 = scalar_lea.vmem %s936_s2, %s861_s26  ;;  %s273_s6 = scalar_lea.vmem %s937_s3, %s861_s26  ;;  %285 = vst.msk [vmem:[#allocation4] sm:$0xf] (!%p525_p7), %vm282_vm0, %v709_v0 }
  0x3d   : > { %s871_s11 = sadd.s32 %s532_s23, %s262_s13  ;;  %s277_s15 = scalar_lea.vmem %s938_s4, %s861_s26 }
  0x3e   : > { %s265_s5 = scalar_lea.vmem %s935_s1, %s871_s11  ;;  %281 = sbr.rel (%p525_p7) target bundleno = 69 (0x45), region = 36 }
  0x45 PF: > { %v286_v1 = vld [vmem:[%s220_s28] sm:$0xf]  ;;  %vm295_vm1 = vcmask 1043456   ;;  %v291_v15 = vlaneseq  ;;  %v287_v20 = vld [vmem:[%s265_s5] sm:$0x1]  ;;  %s526_s28 = sshll.u32 %s690_s18, 7 }
  0x46   : > { %v296_v2 = vsel %vm295_vm1, %v286_v1, -inf  ;;  %v288_v22 = vunpack.c.0.s8 %v287_v20  ;;  %s290_s13 = ssub.s32 288, %s526_s28  ;;  %v710_v32 = vmov 0.0   ;;  %v326_v37 = vld [vmem:[#allocation2] sm:$0xf]  ;;  %vm332_vm5 = vcmask 3072  }
  0x47   : > { %v297_v3 = vrot.slane %v296_v2, 4  ;;  %v319_v19 = vshrl.u32 %v291_v15, 7  ;;  %v292_v24 = vand.u32 127, %v291_v15  ;;  %v293_v26 = vstv %s290_s13  ;;  %v342_v38 = vld [vmem:[#allocation4] sm:$0xf]  ;;  %p528_p12 = scmp.ne.s32.totalorder %s690_s18, 2 }
  0x48   : > { %v334_v43 = vld [vmem:[#allocation3] sm:$0xf] }
  0x49   : > { %v298_v4 = vmax.f32 %v296_v2, %v297_v3  ;;  %v322_v23 = vsub.s32 0, %v319_v19  ;;  %vm294_vm2 = vcmp.lt.s32.totalorder %v292_v24, %v293_v26 }
  0x4b   : > { %v299_v5 = vrot.slane %v298_v4, 2  ;;  %v323_v25 = vrot.slane %v288_v22, %v322_v23 }
  0x4d   : > { %v300_v6 = vmax.f32 %v298_v4, %v299_v5  ;;  %vm324_vm3 = vcmp.eq.s32.totalorder %v323_v25, %v319_v19 }
  0x4e   : > { %vm325_vm4 = vmand %vm324_vm3, %vm294_vm2 }
  0x4f   : > { %v301_v7 = vrot.slane %v300_v6, 1  ;;  %v527_v33 = vsel %vm325_vm4, 1.0, %v710_v32 }
  0x50   : > { %v337_v36 = vsel %vm295_vm1, %v527_v33, 0.0 }
  0x51   : > { %v302_v8 = vmax.f32 %v300_v6, %v301_v7 }
  0x53   : > { %v303_v9 = vsub.f32 %v286_v1, %v302_v8 }
  0x55   : > { %v304_v10 = vmul.f32 1.442695, %v303_v9 }
  0x57   : > { %606 = vpow2.f32 %v304_v10 }
  0x61   : > { %v607_v11 = vpop.eup %606 }
  0x62   : > { %v306_v12 = vsel %vm295_vm1, %v607_v11, 0.0 }
  0x63   : > { %v307_v13 = vrot.slane %v306_v12, 4 }
  0x65   : > { %v308_v14 = vadd.f32 %v307_v13, %v306_v12 }
  0x67   : > { %v309_v16 = vrot.slane %v308_v14, 2 }
  0x69   : > { %v310_v17 = vadd.f32 %v309_v16, %v308_v14 }
  0x6b   : > { %v311_v18 = vrot.slane %v310_v17, 1 }
  0x6d   : > { %v312_v21 = vadd.f32 %v311_v18, %v310_v17 }
  0x6f   : > { %608 = vrcp.f32 %v312_v21 }
  0x79   : > { %v609_v27 = vpop.eup %608 }
  0x7a   : > { %v314_v28 = vmul.f32 %v609_v27, %v607_v11 }
  0x7c   : > { %v317_v29 = vsel %vm294_vm2, %v314_v28, 0.0 }
  0x7d   : > { %v327_v30 = vsel %vm325_vm4, %v317_v29, 0.0  ;;  %v343_v31 = vmul.f32 %v317_v29, %v317_v29 }
  0x7e   : > { %v328_v34 = vsel %vm295_vm1, %v327_v30, 0.0 }
  0x7f   : > { %329 = vadd.xlane.f32.xlu0 %v328_v34  ;;  %v344_v35 = vsel %vm295_vm1, %v343_v31, 0.0 }
  0x80   : > { %345 = vadd.xlane.f32.xlu1 %v344_v35 }
  0x83   : > { %338 = vadd.xlane.f32.xlu0 %v337_v36 }
 0x10c   : > { %v330_v39 = vpop.xlane.xlu0 %329 }
 0x10d   : > { %v331_v40 = vadd.f32 %v330_v39, %v326_v37  ;;  %v346_v41 = vpop.xlane.xlu1 %345  ;;  %352 = sbr.rel (%p528_p12) target bundleno = 284 (0x11c), region = 40 }
 0x10e   : > { %v347_v42 = vadd.f32 %v346_v41, %v342_v38 }
 0x10f   : > { %333 = vst.msk [vmem:[#allocation2] sm:$0xf] %vm332_vm5, %v331_v40 }
 0x110   : > { %348 = vst.msk [vmem:[#allocation4] sm:$0xf] %vm332_vm5, %v347_v42  ;;  %v339_v44 = vpop.xlane.xlu0 %338 }
 0x111   : > { %v340_v45 = vadd.f32 %v339_v44, %v334_v43 }
 0x113   : > { %341 = vst.msk [vmem:[#allocation3] sm:$0xf] %vm332_vm5, %v340_v45 }
 0x116   : > { %v353_v46 = vld [vmem:[#allocation2] sm:$0xf] }
 0x117   : > { %v357_v48 = vld [vmem:[#allocation4] sm:$0xf]  ;;  %354 = vst.msk [vmem:[%s269_s8] sm:$0xf] %vm332_vm5, %v353_v46 }
 0x118   : > { %358 = vst.msk [vmem:[%s277_s15] sm:$0xf] %vm332_vm5, %v357_v48 }
 0x11a   : > { %v355_v47 = vld [vmem:[#allocation3] sm:$0xf] }
 0x11b   : > { %356 = vst.msk [vmem:[%s273_s6] sm:$0xf] %vm332_vm5, %v355_v47 }
 0x11c PF: > { %s18_s22 = sadd.s32 1, %s706_s22   ;;  %s944_s15 = smov %s682_s16 }
 0x11d   : > { %p15_p8 = scmp.ge.s32.totalorder %s18_s22, 8   ;;  %s945_s16 = smov %s686_s17 }
 0x11e   : > { %s946_s17 = smov %s803_s9  ;;  %s947_s18 = smov %s698_s20 }
 0x11f   : > { %s948_s19 = smov %s702_s21  ;;  %s949_s20 = smov %s952_s24 }
 0x120   : > { %s950_s21 = smov %s956_s25  ;;  %17 = sbr.rel (!%p15_p8) target bundleno = 5 (0x5), region = 103 }
 0x127   :  { %406 = vsyncpa [#allocation6], 1 }
 0x128   :  { %408 = vsyncpa [#allocation6 + $0x1], 1 }

</bundles_post_ra>
